<compile_context>
chip_gen: v7x
topology: tpu7x:2x2x1
jax: 0.10.0
libtpu: 0.0.40
codegen_flags: <defaults>
</compile_context>

<pallas_src>
import functools

import jax
import jax.numpy as jnp
from jax.experimental import pallas as pl
from jax.experimental.pallas import tpu as pltpu

SMOOTHING = 0.1


def _nll_smooth_kernel(x_ref, t_ref, o_ref, *, inv_c, confidence, smoothing):
    """One (block_rows, C) tile -> per-row losses (block_rows, 1)."""
    x = x_ref[...].astype(jnp.float32)
    t = t_ref[...].astype(jnp.float32)

    # Stable log-softmax pieces (no (rows, C) logprobs array is materialized).
    m = jnp.max(x, axis=-1, keepdims=True)
    shifted = x - m
    lse = jnp.log(jnp.sum(jnp.exp(shifted), axis=-1, keepdims=True))

    # Lane reductions only; all shapes below are (block_rows, 1).
    t_sum = jnp.sum(t, axis=-1, keepdims=True)
    st_sum = jnp.sum(shifted * t, axis=-1, keepdims=True)
    s_mean = jnp.sum(shifted, axis=-1, keepdims=True) * inv_c

    # nll    = sum(-(shifted - lse) * t) = lse * sum(t) - sum(shifted * t)
    # smooth = mean(-(shifted - lse))    = lse - mean(shifted)
    nll_loss = lse * t_sum - st_sum
    smooth_loss = lse - s_mean

    o_ref[...] = confidence * nll_loss + smoothing * smooth_loss


def _round_down(v, m):
    return (v // m) * m


def _round_up(v, m):
    return ((v + m - 1) // m) * m


def _vmem_limit_bytes():
    """Scoped VMEM limit per generation (75% of physical, capped at 96 MiB)."""
    try:
        cap = pltpu.get_tpu_info().vmem_capacity_bytes
    except Exception:  # pragma: no cover - conservative fallback (v7x-sized)
        cap = 64 * 1024 * 1024
    return int(min(cap * 3 // 4, 96 * 1024 * 1024))


def _pick_block_rows(n, c, x_dtype, t_dtype, vmem_limit, max_rows_cap=8192):
    """Largest row tile fitting ~half the scoped VMEM limit.

    Budget per row of a tile:
      2 inputs x 2 pipeline buffers in the input dtype
      + ~4 tile-sized f32 temporaries inside the kernel body.
    """
    x_bytes = jnp.dtype(x_dtype).itemsize
    t_bytes = jnp.dtype(t_dtype).itemsize
    # Sublane packing: 8 rows for 4B dtypes, 16 for 2B (bf16), 32 for 1B.
    row_align = max(8, 32 // min(x_bytes, t_bytes))

    budget = vmem_limit // 2  # leave headroom for compiler temporaries/spills
    bytes_per_row = c * (2 * (x_bytes + t_bytes) + 4 * 4)
    rows = _round_down(max(budget // bytes_per_row, row_align), row_align)
    rows = max(rows, row_align)
    rows = min(rows, max_rows_cap, _round_up(n, row_align))
    return rows


def nll_multilabel_smooth(x, target, *, smoothing=SMOOTHING):
    """Training-mode NLLMultiLabelSmooth forward. x, target: (N, C)."""
    n, c = x.shape
    assert target.shape == (n, c)
    confidence = 1.0 - smoothing

    vmem_limit = _vmem_limit_bytes()
    block_rows = _pick_block_rows(n, c, x.dtype, target.dtype, vmem_limit)

    n_pad = _round_up(n, block_rows)
    if n_pad != n:
        pad = n_pad - n
        x = jnp.pad(x, ((0, pad), (0, 0)))
        target = jnp.pad(target, ((0, pad), (0, 0)))

    kernel = functools.partial(
        _nll_smooth_kernel,
        inv_c=1.0 / float(c),
        confidence=float(confidence),
        smoothing=float(smoothing),
    )

    per_row = pl.pallas_call(
        kernel,
        out_shape=jax.ShapeDtypeStruct((n_pad, 1), jnp.float32),
        grid_spec=pltpu.PrefetchScalarGridSpec(
            num_scalar_prefetch=0,
            grid=(n_pad // block_rows,),
            in_specs=[
                pl.BlockSpec((block_rows, c), lambda i: (i, 0)),
                pl.BlockSpec((block_rows, c), lambda i: (i, 0)),
            ],
            out_specs=pl.BlockSpec((block_rows, 1), lambda i: (i, 0)),
        ),
        compiler_params=pltpu.CompilerParams(
            dimension_semantics=("parallel",),
            vmem_limit_bytes=vmem_limit,
        ),
    )(x, target)

    # Final mean in JAX (padded rows sliced away before the reduction).
    return jnp.mean(per_row[:n, 0])


def _reference(x, target, smoothing=SMOOTHING):
    x = x.astype(jnp.float32)
    target = target.astype(jnp.float32)
    logprobs = jax.nn.log_softmax(x, axis=-1)
    nll_loss = jnp.sum(-logprobs * target, axis=-1)
    smooth_loss = jnp.mean(-logprobs, axis=-1)
    loss = (1.0 - smoothing) * nll_loss + smoothing * smooth_loss
    return jnp.mean(loss)


if __name__ == "__main__":
    key = jax.random.PRNGKey(0)
    k1, k2, k3, k4 = jax.random.split(key, 4)

    # 1) f32, block-divisible batch
    N, C = 16, 32
    x = jax.random.normal(k1, (N, C), dtype=jnp.float32)
    labels = jax.random.randint(k2, (N,), 0, C)
    target = jax.nn.one_hot(labels, C, dtype=jnp.float32)
    loss = jax.block_until_ready(nll_multilabel_smooth(x, target))
    ref = _reference(x, target)
    assert jnp.allclose(loss, ref, atol=1e-5, rtol=1e-5), (loss, ref)

    # 2) f32, ragged batch (exercises the padded tail path)
    N2, C2 = 13, 32
    x2 = jax.random.normal(k3, (N2, C2), dtype=jnp.float32)
    t2 = jax.nn.one_hot(jax.random.randint(k4, (N2,), 0, C2), C2, dtype=jnp.float32)
    loss2 = jax.block_until_ready(nll_multilabel_smooth(x2, t2))
    ref2 = _reference(x2, t2)
    assert jnp.allclose(loss2, ref2, atol=1e-5, rtol=1e-5), (loss2, ref2)

    # 3) bf16 inputs stay bf16 in HBM; widened to f32 inside the kernel
    N3, C3 = 32, 128
    x3 = jax.random.normal(k1, (N3, C3), dtype=jnp.bfloat16)
    t3 = jax.nn.one_hot(jax.random.randint(k2, (N3,), 0, C3), C3, dtype=jnp.bfloat16)
    loss3 = jax.block_until_ready(nll_multilabel_smooth(x3, t3))
    ref3 = _reference(x3, t3)
    assert jnp.allclose(loss3, ref3, atol=1e-3, rtol=1e-3), (loss3, ref3)

    print("KERNEL_OK")
</pallas_src>

<mosaic_0001>
module attributes {stable_mosaic.version = 11 : i64} {
  func.func @_nll_smooth_kernel(%arg0: i32, %arg1: memref<16x32xf32, #tpu.memory_space<vmem>>, %arg2: memref<16x32xf32, #tpu.memory_space<vmem>>, %arg3: memref<16x1xf32, #tpu.memory_space<vmem>>) attributes {dimension_semantics = [#tpu.dimension_semantics<parallel>], iteration_bounds = array<i64: 1>, scalar_prefetch = 0 : i64, scratch_operands = 0 : i64, tpu.core_type = #tpu.core_type<tc>, window_params = [{transform_indices = @transform_0, window_bounds = array<i64: 16, 32>}, {transform_indices = @transform_1, window_bounds = array<i64: 16, 32>}, {transform_indices = @transform_2, window_bounds = array<i64: 16, 1>}]} {
    %c0 = arith.constant 0 : index
    %c0_0 = arith.constant 0 : index
    %0 = vector.load %arg1[%c0, %c0_0] : memref<16x32xf32, #tpu.memory_space<vmem>>, vector<16x32xf32>
    %c0_1 = arith.constant 0 : index
    %c0_2 = arith.constant 0 : index
    %1 = vector.load %arg2[%c0_1, %c0_2] : memref<16x32xf32, #tpu.memory_space<vmem>>, vector<16x32xf32>
    %cst = arith.constant dense<0xFF800000> : vector<16xf32>
    %2 = vector.multi_reduction <maximumf>, %0, %cst [1] : vector<16x32xf32> to vector<16xf32>
    %3 = vector.shape_cast %2 : vector<16xf32> to vector<16x1xf32>
    %4 = vector.broadcast %3 : vector<16x1xf32> to vector<16x32xf32>
    %5 = arith.subf %0, %4 : vector<16x32xf32>
    %6 = math.exp %5 : vector<16x32xf32>
    %cst_3 = arith.constant dense<0.000000e+00> : vector<16xf32>
    %7 = vector.multi_reduction <add>, %6, %cst_3 [1] : vector<16x32xf32> to vector<16xf32>
    %8 = vector.shape_cast %7 : vector<16xf32> to vector<16x1xf32>
    %9 = math.log %8 : vector<16x1xf32>
    %cst_4 = arith.constant dense<0.000000e+00> : vector<16xf32>
    %10 = vector.multi_reduction <add>, %1, %cst_4 [1] : vector<16x32xf32> to vector<16xf32>
    %11 = vector.shape_cast %10 : vector<16xf32> to vector<16x1xf32>
    %12 = arith.mulf %5, %1 : vector<16x32xf32>
    %cst_5 = arith.constant dense<0.000000e+00> : vector<16xf32>
    %13 = vector.multi_reduction <add>, %12, %cst_5 [1] : vector<16x32xf32> to vector<16xf32>
    %14 = vector.shape_cast %13 : vector<16xf32> to vector<16x1xf32>
    %cst_6 = arith.constant dense<0.000000e+00> : vector<16xf32>
    %15 = vector.multi_reduction <add>, %5, %cst_6 [1] : vector<16x32xf32> to vector<16xf32>
    %16 = vector.shape_cast %15 : vector<16xf32> to vector<16x1xf32>
    %cst_7 = arith.constant 3.125000e-02 : f32
    %17 = vector.broadcast %cst_7 : f32 to vector<16x1xf32>
    %18 = arith.mulf %16, %17 : vector<16x1xf32>
    %19 = arith.mulf %9, %11 : vector<16x1xf32>
    %20 = arith.subf %19, %14 : vector<16x1xf32>
    %21 = arith.subf %9, %18 : vector<16x1xf32>
    %cst_8 = arith.constant 0.899999976 : f32
    %22 = vector.broadcast %cst_8 : f32 to vector<16x1xf32>
    %23 = arith.mulf %22, %20 : vector<16x1xf32>
    %cst_9 = arith.constant 1.000000e-01 : f32
    %24 = vector.broadcast %cst_9 : f32 to vector<16x1xf32>
    %25 = arith.mulf %24, %21 : vector<16x1xf32>
    %26 = arith.addf %23, %25 : vector<16x1xf32>
    %c0_10 = arith.constant 0 : index
    %c0_11 = arith.constant 0 : index
    %27 = vector.load %arg3[%c0_10, %c0_11] : memref<16x1xf32, #tpu.memory_space<vmem>>, vector<16x1xf32>
    tpu.vector_store %arg3[%c0_10, %c0_11], %26 {strides = array<i32>} : memref<16x1xf32, #tpu.memory_space<vmem>>, vector<16x1xf32>,
    return
  }
  func.func @transform_0(%arg0: i32) -> (i32, i32) {
    %c0_i32 = arith.constant 0 : i32
    %c0_i32_0 = arith.constant 0 : i32
    return %arg0, %c0_i32 : i32, i32
  }
  func.func @transform_1(%arg0: i32) -> (i32, i32) {
    %c0_i32 = arith.constant 0 : i32
    %c0_i32_0 = arith.constant 0 : i32
    return %arg0, %c0_i32 : i32, i32
  }
  func.func @transform_2(%arg0: i32) -> (i32, i32) {
    %c0_i32 = arith.constant 0 : i32
    %c0_i32_0 = arith.constant 0 : i32
    return %arg0, %c0_i32 : i32, i32
  }
}

</mosaic_0001>

<bundles_post_ra>
// kernel: tpu_custom_call.1
= control target key start
LH: loop header
LB: loop body
LE: loop exit
PB: predicated region body
PF: predicated region fallthrough
CT: control target
= control target key end

     0   :  { %7 = vsyncpa [#allocation3], 0  ;;  %s228_s0 = inlined_call_operand.hbm [shape: f32[16,32], index: 0, kind: input, shape index: {}]   ;;  %s229_s1 = inlined_call_operand.hbm [shape: f32[16,32], index: 1, kind: input, shape index: {}]   ;;  %s230_s2 = inlined_call_operand.vmem [shape: f32[16,1], index: 2, kind: output, shape index: {}]  }
   0x1   :  { %8 = vsyncpa [#allocation5], 0  ;;  %s169_s9 = smov [#allocation2]   ;;  %s121_s13 = scalar_lea.hbm %s228_s0, 256 }
   0x2   :  { %s14_s10 = sshll.u32 %s169_s9, 4  ;;  %p122_p0 = scmp.ne.s32.totalorder %s228_s0, %s121_s13  ;;  %s15_s10 = int_to_ptr.vmem [resolvable:$true] %s14_s10 }
   0x3   :  { %p125_p1 = scmp.lt.u32.totalorder %s121_s13, %s228_s0 }
   0x5   :  { %p127_p2 = pnand %p125_p1, %p122_p0 }
   0x7   :  { %130 = shalt.err (!%p127_p2)
}
   0x8   :  { %s131_s18 = scalar_lea.vmem %s15_s10, 256  ;;  %p136_p4 = scmp.lt.s32.totalorder %s15_s10, %s15_s10 }
   0x9   :  { %p132_p3 = scmp.ne.s32.totalorder %s15_s10, %s131_s18  ;;  %p137_p5 = scmp.lt.s32.totalorder %s131_s18, %s131_s18 }
   0xb   :  { %p138_p6 = por %p137_p5, %p136_p4 }
   0xd   :  { %p139_p7 = pnand %p138_p6, %p132_p3 }
   0xf   :  { %142 = shalt.err (!%p139_p7)
}
  0x10   :  { %s170_s19 = smov 128   ;;  %s171_s20 = smov 8  }
  0x11   :  { %20 = dma.hbm_to_vmem [thread:$0]  %s228_s0, 256, %s15_s10, [#allocation3], %s170_s19, %s170_s19, %s171_s20  }
  0x12   :  { %s172_s23 = smov [#allocation4]   ;;  %s143_s27 = scalar_lea.hbm %s229_s1, 256 }
  0x13   :  { %s26_s24 = sshll.u32 %s172_s23, 4  ;;  %p144_p8 = scmp.ne.s32.totalorder %s229_s1, %s143_s27  ;;  %s27_s24 = int_to_ptr.vmem [resolvable:$true] %s26_s24 }
  0x14   :  { %p147_p9 = scmp.lt.u32.totalorder %s143_s27, %s229_s1 }
  0x16   :  { %p149_p10 = pnand %p147_p9, %p144_p8 }
  0x18   :  { %152 = shalt.err (!%p149_p10)
}
  0x19   :  { %s153_s4 = scalar_lea.vmem %s27_s24, 256  ;;  %p158_p12 = scmp.lt.s32.totalorder %s27_s24, %s27_s24 }
  0x1a   :  { %p154_p11 = scmp.ne.s32.totalorder %s27_s24, %s153_s4  ;;  %p159_p13 = scmp.lt.s32.totalorder %s153_s4, %s153_s4 }
  0x1c   :  { %p160_p0 = por %p159_p13, %p158_p12 }
  0x1e   :  { %p161_p1 = pnand %p160_p0, %p154_p11 }
  0x20   :  { %164 = shalt.err (!%p161_p1)
}
  0x21   :  { %32 = dma.hbm_to_vmem [thread:$0]  %s229_s1, 256, %s27_s24, [#allocation5], %s170_s19, %s170_s19, %s171_s20  }
  0x22   :  { %165 = dma.done.wait [#allocation3], 256  }
  0x23   :  { %166 = vsyncadd [#allocation3], 4294967040 }
  0x24   :  { %167 = dma.done.wait [#allocation5], 256  }
  0x25   :  { %168 = vsyncadd [#allocation5], 4294967040  ;;  %vm43_vm0 = vcmask 261120   ;;  %v39_v0 = vld [vmem:[#allocation2] sm:$0xff]  ;;  %v40_v1 = vld [vmem:[#allocation2 + $0x8] sm:$0xff]  ;;  %vm100_vm1 = vcmask 7168  }
  0x26   :  { %v44_v2 = vsel %vm43_vm0, %v39_v0, -inf  ;;  %v47_v3 = vsel %vm43_vm0, %v40_v1, -inf  ;;  %v41_v4 = vld [vmem:[#allocation4] sm:$0xff]  ;;  %v42_v19 = vld [vmem:[#allocation4 + $0x8] sm:$0xff] }
  0x27   :  { %45 = vmax.xlane.f32.xlu0 %v44_v2  ;;  %v66_v5 = vsel %vm43_vm0, %v41_v4, 0.0  ;;  %v69_v20 = vsel %vm43_vm0, %v42_v19, 0.0 }
  0x2b   :  { %48 = vmax.xlane.f32.xlu0 %v47_v3 }
  0x2f   :  { %67 = vadd.xlane.f32.xlu0 %v66_v5 }
  0xb4   :  { %v46_v6 = vpop.xlane.xlu0 %45 }
  0xb5   :  { %v50_v7 = vsub.f32 %v39_v0, %v46_v6 }
  0xb7   :  { %v52_v8 = vmul.f32 1.442695, %v50_v7  ;;  %v80_v9 = vsel %vm43_vm0, %v50_v7, 0.0  ;;  %v72_v10 = vmul.f32 %v50_v7, %v41_v4 }
  0xb8   :  { %81 = vadd.xlane.f32.xlu0 %v80_v9  ;;  %v49_v11 = vpop.xlane.xlu0 %48 }
  0xb9   :  { %113 = vpow2.f32 %v52_v8  ;;  %v51_v12 = vsub.f32 %v40_v1, %v49_v11  ;;  %v74_v14 = vsel %vm43_vm0, %v72_v10, 0.0 }
  0xbb   :  { %v54_v13 = vmul.f32 1.442695, %v51_v12  ;;  %v83_v21 = vsel %vm43_vm0, %v51_v12, 0.0  ;;  %v73_v22 = vmul.f32 %v51_v12, %v42_v19 }
  0xbc   :  { %75 = vadd.xlane.f32.xlu0 %v74_v14  ;;  %v68_v25 = vpop.xlane.xlu0 %67 }
  0xbd   :  { %115 = vpow2.f32 %v54_v13  ;;  %v77_v23 = vsel %vm43_vm0, %v73_v22, 0.0 }
  0xc3   :  { %v114_v15 = vpop.eup %113 }
  0xc4   :  { %v56_v16 = vsel %vm43_vm0, %v114_v15, 0.0 }
  0xc5   :  { %57 = vadd.xlane.f32.xlu1 %v56_v16 }
  0xc7   :  { %v116_v17 = vpop.eup %115 }
  0xc8   :  { %v59_v18 = vsel %vm43_vm0, %v116_v17, 0.0 }
  0xc9   :  { %60 = vadd.xlane.f32.xlu1 %v59_v18 }
  0xcd   :  { %70 = vadd.xlane.f32.xlu1 %v69_v20 }
  0xd1   :  { %84 = vadd.xlane.f32.xlu1 %v83_v21 }
  0xd5   :  { %78 = vadd.xlane.f32.xlu1 %v77_v23 }
 0x145   :  { %v82_v28 = vpop.xlane.xlu0 %81 }
 0x146   :  { %v86_v30 = vmul.f32 0.03125, %v82_v28 }
 0x149   :  { %v76_v36 = vpop.xlane.xlu0 %75 }
 0x152   :  { %v58_v24 = vpop.xlane.xlu1 %57 }
 0x153   :  { %117 = vlog2.f32 %v58_v24 }
 0x156   :  { %v61_v26 = vpop.xlane.xlu1 %60 }
 0x157   :  { %119 = vlog2.f32 %v61_v26 }
 0x15a   :  { %v71_v27 = vpop.xlane.xlu1 %70 }
 0x15d   :  { %v118_v29 = vpop.eup %117 }
 0x15e   :  { %v63_v31 = vmul.f32 0.6931472, %v118_v29  ;;  %v85_v32 = vpop.xlane.xlu1 %84 }
 0x15f   :  { %v87_v39 = vmul.f32 0.03125, %v85_v32 }
 0x160   :  { %v88_v33 = vmul.f32 %v68_v25, %v63_v31  ;;  %v92_v34 = vsub.f32 %v63_v31, %v86_v30 }
 0x161   :  { %v120_v35 = vpop.eup %119 }
 0x162   :  { %v90_v37 = vsub.f32 %v88_v33, %v76_v36  ;;  %v65_v38 = vmul.f32 0.6931472, %v120_v35  ;;  %v96_v41 = vmul.f32 0.1, %v92_v34  ;;  %v79_v44 = vpop.xlane.xlu1 %78 }
 0x164   :  { %v94_v40 = vmul.f32 0.9, %v90_v37  ;;  %v89_v42 = vmul.f32 %v71_v27, %v65_v38  ;;  %v93_v43 = vsub.f32 %v65_v38, %v87_v39 }
 0x166   :  { %v98_v45 = vadd.f32 %v96_v41, %v94_v40  ;;  %v91_v46 = vsub.f32 %v89_v42, %v79_v44  ;;  %v97_v47 = vmul.f32 0.1, %v93_v43 }
 0x168   :  { %v95_v48 = vmul.f32 0.9, %v91_v46  ;;  %101 = vst.msk [vmem:[%s230_s2] sm:$0xff] %vm100_vm1, %v98_v45 }
 0x16a   :  { %v99_v49 = vadd.f32 %v97_v47, %v95_v48 }
 0x16c   :  { %102 = vst.msk [vmem:[%s230_s2 + $0x8] sm:$0xff] %vm100_vm1, %v99_v49 }
 0x16d   :  { %107 = vsyncpa [#allocation3], 1 }
 0x16e   :  { %108 = vsyncpa [#allocation5], 1 }

</bundles_post_ra>
